<compile_context>
chip_gen: v7x
topology: tpu7x:2x2x1
jax: 0.10.0
libtpu: 0.0.40
codegen_flags: <defaults>
</compile_context>

<pallas_src>
import functools

import jax
import jax.numpy as jnp
from jax import lax
from jax.experimental import pallas as pl
from jax.experimental.pallas import tpu as pltpu


def _round_up(n, m):
    return ((n + m - 1) // m) * m


def _encoder_kernel(x_ref, mkw_ref, mvw_ref, w1_ref, w2_ref, o_ref,
                    colsum_ref, *, n_rows, block_n):
    p = pl.program_id(0)   # 0: accumulate column sums, 1: compute outputs
    i = pl.program_id(1)   # batch tile index

    x_bf = x_ref[...]                                            # (TN, D) bf16

    # Row-softmaxed attention (f32 math, bf16 MXU matmul).
    logits = jnp.dot(x_bf, mkw_ref[...],
                     preferred_element_type=jnp.float32)         # (TN, S)
    logits = logits - jnp.max(logits, axis=1, keepdims=True)
    e = jnp.exp(logits)
    row_norm = e * pl.reciprocal(jnp.sum(e, axis=1, keepdims=True),
                                 approx=True)                    # (TN, S)

    @pl.when(p == 0)
    def _accumulate_column_sums():
        @pl.when(i == 0)
        def _init():
            colsum_ref[...] = jnp.zeros_like(colsum_ref)

        contrib = row_norm
        if n_rows % block_n != 0:
            # Mask zero-padded batch rows so they don't pollute the sum.
            row_ids = i * block_n + lax.broadcasted_iota(
                jnp.int32, (block_n, 1), 0)
            contrib = contrib * (row_ids < n_rows).astype(jnp.float32)
        colsum_ref[...] += jnp.sum(contrib, axis=0, keepdims=True)

    @pl.when(p == 1)
    def _compute_outputs():
        @pl.when(i == 0)
        def _invert_once():
            # Invert the column sums a single time; every batch tile below
            # then only needs a broadcast multiply.
            colsum_ref[...] = pl.reciprocal(colsum_ref[...], approx=True)

        attn = row_norm * colsum_ref[...]                        # (TN, S) f32
        x_i = jnp.dot(attn.astype(jnp.bfloat16), mvw_ref[...],
                      preferred_element_type=jnp.float32)        # (TN, D)
        resid = (x_bf.astype(jnp.float32) + x_i).astype(jnp.bfloat16)
        h = jnp.dot(resid, w1_ref[...],
                    preferred_element_type=jnp.float32)          # (TN, H)
        h = jnp.maximum(h, 0.2 * h)                              # LeakyReLU(0.2)
        out = jnp.dot(h.astype(jnp.bfloat16), w2_ref[...],
                      preferred_element_type=jnp.float32)        # (TN, O)
        o_ref[...] = out.astype(o_ref.dtype)


def prepare_encoder_params(mk_w, mv_w, w1, w2, dtype=jnp.bfloat16):
    """Transpose the PyTorch-layout Linear weights ONCE (to (in, out)) and
    cast to the matmul dtype.  Call this at parameter-init time, not per step.
       mk_w: (S, D), mv_w: (D, S), w1: (H, D), w2: (O, H)."""
    return (mk_w.T.astype(dtype),   # (D, S)
            mv_w.T.astype(dtype),   # (S, D)
            w1.T.astype(dtype),     # (D, H)
            w2.T.astype(dtype))     # (H, O)


def encoder_forward(x, params, *, block_n=512):
    """x: (N, D) float32.  params: output of prepare_encoder_params."""
    mkw, mvw, w1t, w2t = params
    N, D = x.shape
    S = mkw.shape[1]
    H = w1t.shape[1]
    O = w2t.shape[1]

    tn = min(block_n, _round_up(N, 8))
    n_tiles = pl.cdiv(N, tn)
    n_pad = n_tiles * tn

    x_bf = x.astype(jnp.bfloat16)
    if n_pad != N:
        x_bf = jnp.pad(x_bf, ((0, n_pad - N), (0, 0)))

    kernel = functools.partial(_encoder_kernel, n_rows=N, block_n=tn)

    out = pl.pallas_call(
        kernel,
        out_shape=jax.ShapeDtypeStruct((n_pad, O), jnp.float32),
        grid_spec=pltpu.PrefetchScalarGridSpec(
            num_scalar_prefetch=0,
            grid=(2, n_tiles),                      # (pass, batch tile)
            in_specs=[
                pl.BlockSpec((tn, D), lambda p, i: (i, 0)),   # x tile
                pl.BlockSpec((D, S), lambda p, i: (0, 0)),    # mk^T (resident)
                pl.BlockSpec((S, D), lambda p, i: (0, 0)),    # mv^T (resident)
                pl.BlockSpec((D, H), lambda p, i: (0, 0)),    # W1^T (resident)
                pl.BlockSpec((H, O), lambda p, i: (0, 0)),    # W2^T (resident)
            ],
            # Pass 0 never writes the output; park it on block 0 so all output
            # block revisits are consecutive and pass 0 causes no writebacks.
            out_specs=pl.BlockSpec((tn, O), lambda p, i: (i * p, 0)),
            scratch_shapes=[pltpu.VMEM((1, S), jnp.float32)],  # column sums
        ),
        compiler_params=pltpu.CompilerParams(
            # Column-sum scratch is shared across both grid axes -> arbitrary.
            dimension_semantics=("arbitrary", "arbitrary"),
            vmem_limit_bytes=48 * 1024 * 1024,
        ),
    )(x_bf, mkw, mvw, w1t, w2t)

    return out[:N] if n_pad != N else out


def encoder_reference(x, mk_w, mv_w, w1, w2):
    attn = x @ mk_w.T
    attn = jax.nn.softmax(attn, axis=1)
    attn = attn / jnp.sum(attn, axis=0, keepdims=True)
    x_i = attn @ mv_w.T
    h = (x + x_i) @ w1.T
    h = jnp.where(h > 0, h, 0.2 * h)
    return h @ w2.T


if __name__ == "__main__":
    # Small shapes consistent with Encoder(Input_dim, Hidden_dim, Output_dim), S=32.
    # N=24 with block_n=16 exercises multiple batch tiles + padded-row masking.
    N, D, S, H, O = 24, 64, 32, 128, 256

    key = jax.random.PRNGKey(0)
    kx, kmk, kmv, k1, k2 = jax.random.split(key, 5)

    x = jax.random.normal(kx, (N, D), dtype=jnp.float32)

    # ExternalAttention Linear weights: init.normal_(std=0.001), no bias.
    mk_w = 0.001 * jax.random.normal(kmk, (S, D), dtype=jnp.float32)
    mv_w = 0.001 * jax.random.normal(kmv, (D, S), dtype=jnp.float32)
    # Sequential Linear weights (bias=False), deterministic synthetic init.
    w1 = jax.random.normal(k1, (H, D), dtype=jnp.float32) / jnp.sqrt(D)
    w2 = jax.random.normal(k2, (O, H), dtype=jnp.float32) / jnp.sqrt(H)

    params = prepare_encoder_params(mk_w, mv_w, w1, w2)  # transpose + bf16, once

    out = encoder_forward(x, params, block_n=16)
    out = jax.block_until_ready(out)

    ref = encoder_reference(x, mk_w, mv_w, w1, w2)
    assert out.shape == (N, O)
    # bf16 matmuls + approx reciprocals -> compare against f32 reference with
    # a bf16-appropriate tolerance.
    assert jnp.allclose(out, ref, atol=5e-2, rtol=5e-2), "mismatch vs reference"

    print("KERNEL_OK")
</pallas_src>

<mosaic_0001>
module attributes {stable_mosaic.version = 11 : i64} {
  func.func @_encoder_kernel(%arg0: i32, %arg1: i32, %arg2: memref<16x64xbf16, #tpu.memory_space<vmem>>, %arg3: memref<64x32xbf16, #tpu.memory_space<vmem>>, %arg4: memref<32x64xbf16, #tpu.memory_space<vmem>>, %arg5: memref<64x128xbf16, #tpu.memory_space<vmem>>, %arg6: memref<128x256xbf16, #tpu.memory_space<vmem>>, %arg7: memref<16x256xf32, #tpu.memory_space<vmem>>, %arg8: memref<1x32xf32, #tpu.memory_space<vmem>>) attributes {dimension_semantics = [#tpu.dimension_semantics<arbitrary>, #tpu.dimension_semantics<arbitrary>], iteration_bounds = array<i64: 2, 2>, scalar_prefetch = 0 : i64, scratch_operands = 1 : i64, tpu.core_type = #tpu.core_type<tc>, window_params = [{transform_indices = @transform_0, window_bounds = array<i64: 16, 64>}, {pipeline_mode = #tpu.pipeline_mode<synchronous>, transform_indices = @transform_1, window_bounds = array<i64: 64, 32>}, {pipeline_mode = #tpu.pipeline_mode<synchronous>, transform_indices = @transform_2, window_bounds = array<i64: 32, 64>}, {pipeline_mode = #tpu.pipeline_mode<synchronous>, transform_indices = @transform_3, window_bounds = array<i64: 64, 128>}, {pipeline_mode = #tpu.pipeline_mode<synchronous>, transform_indices = @transform_4, window_bounds = array<i64: 128, 256>}, {transform_indices = @transform_5, window_bounds = array<i64: 16, 256>}]} {
    %c0 = arith.constant 0 : index
    %c0_0 = arith.constant 0 : index
    %0 = vector.load %arg2[%c0, %c0_0] : memref<16x64xbf16, #tpu.memory_space<vmem>>, vector<16x64xbf16>
    %c0_1 = arith.constant 0 : index
    %c0_2 = arith.constant 0 : index
    %1 = vector.load %arg3[%c0_1, %c0_2] : memref<64x32xbf16, #tpu.memory_space<vmem>>, vector<64x32xbf16>
    %cst = arith.constant dense<0.000000e+00> : vector<16x32xf32>
    %2 = tpu.matmul %0, %1, %cst {dimension_numbers = #tpu.dot_dimension_numbers<[1], [0], [0], [1], [0, 0, 1, 1], [], []>} : vector<16x64xbf16>, vector<64x32xbf16>, vector<16x32xf32> -> vector<16x32xf32>
    %cst_3 = arith.constant dense<0xFF800000> : vector<16xf32>
    %3 = vector.multi_reduction <maximumf>, %2, %cst_3 [1] : vector<16x32xf32> to vector<16xf32>
    %4 = vector.shape_cast %3 : vector<16xf32> to vector<16x1xf32>
    %5 = vector.broadcast %4 : vector<16x1xf32> to vector<16x32xf32>
    %6 = arith.subf %2, %5 : vector<16x32xf32>
    %7 = math.exp %6 : vector<16x32xf32>
    %cst_4 = arith.constant dense<0.000000e+00> : vector<16xf32>
    %8 = vector.multi_reduction <add>, %7, %cst_4 [1] : vector<16x32xf32> to vector<16xf32>
    %9 = vector.shape_cast %8 : vector<16xf32> to vector<16x1xf32>
    %10 = tpu.reciprocal %9 {approx = true} : vector<16x1xf32> -> vector<16x1xf32>
    %11 = vector.broadcast %10 : vector<16x1xf32> to vector<16x32xf32>
    %12 = arith.mulf %7, %11 : vector<16x32xf32>
    %c0_i32 = arith.constant 0 : i32
    %13 = arith.cmpi eq, %arg0, %c0_i32 : i32
    %14 = arith.extui %13 : i1 to i32
    %c0_i32_5 = arith.constant 0 : i32
    %15 = arith.cmpi ne, %14, %c0_i32_5 : i32
    scf.if %15 {
      %c0_i32_7 = arith.constant 0 : i32
      %19 = arith.cmpi eq, %arg1, %c0_i32_7 : i32
      %20 = arith.extui %19 : i1 to i32
      %c0_i32_8 = arith.constant 0 : i32
      %21 = arith.cmpi ne, %20, %c0_i32_8 : i32
      scf.if %21 {
        %cst_14 = arith.constant 0.000000e+00 : f32
        %37 = vector.broadcast %cst_14 : f32 to vector<1x32xf32>
        %c0_15 = arith.constant 0 : index
        %c0_16 = arith.constant 0 : index
        %38 = vector.load %arg8[%c0_15, %c0_16] : memref<1x32xf32, #tpu.memory_space<vmem>>, vector<1x32xf32>
        tpu.vector_store %arg8[%c0_15, %c0_16], %37 {strides = array<i32>} : memref<1x32xf32, #tpu.memory_space<vmem>>, vector<1x32xf32>,
      } else {
      }
      %c16_i32 = arith.constant 16 : i32
      %22 = arith.muli %arg1, %c16_i32 : i32
      %23 = tpu.iota {dimensions = array<i32: 0>} : vector<16x1xi32>
      %24 = vector.broadcast %22 : i32 to vector<16x1xi32>
      %25 = arith.addi %24, %23 : vector<16x1xi32>
      %c24_i32 = arith.constant 24 : i32
      %26 = vector.broadcast %c24_i32 : i32 to vector<16x1xi32>
      %27 = arith.cmpi slt, %25, %26 : vector<16x1xi32>
      %28 = arith.extui %27 : vector<16x1xi1> to vector<16x1xi32>
      %29 = arith.sitofp %28 : vector<16x1xi32> to vector<16x1xf32>
      %30 = vector.broadcast %29 : vector<16x1xf32> to vector<16x32xf32>
      %31 = arith.mulf %12, %30 : vector<16x32xf32>
      %c0_9 = arith.constant 0 : index
      %c0_10 = arith.constant 0 : index
      %32 = vector.load %arg8[%c0_9, %c0_10] : memref<1x32xf32, #tpu.memory_space<vmem>>, vector<1x32xf32>
      %cst_11 = arith.constant dense<0.000000e+00> : vector<32xf32>
      %33 = vector.multi_reduction <add>, %31, %cst_11 [0] : vector<16x32xf32> to vector<32xf32>
      %34 = vector.shape_cast %33 : vector<32xf32> to vector<1x32xf32>
      %35 = arith.addf %32, %34 : vector<1x32xf32>
      %c0_12 = arith.constant 0 : index
      %c0_13 = arith.constant 0 : index
      %36 = vector.load %arg8[%c0_12, %c0_13] : memref<1x32xf32, #tpu.memory_space<vmem>>, vector<1x32xf32>
      tpu.vector_store %arg8[%c0_12, %c0_13], %35 {strides = array<i32>} : memref<1x32xf32, #tpu.memory_space<vmem>>, vector<1x32xf32>,
    } else {
    }
    %c1_i32 = arith.constant 1 : i32
    %16 = arith.cmpi eq, %arg0, %c1_i32 : i32
    %17 = arith.extui %16 : i1 to i32
    %c0_i32_6 = arith.constant 0 : i32
    %18 = arith.cmpi ne, %17, %c0_i32_6 : i32
    scf.if %18 {
      %c0_i32_7 = arith.constant 0 : i32
      %19 = arith.cmpi eq, %arg1, %c0_i32_7 : i32
      %20 = arith.extui %19 : i1 to i32
      %c0_i32_8 = arith.constant 0 : i32
      %21 = arith.cmpi ne, %20, %c0_i32_8 : i32
      scf.if %21 {
        %c0_23 = arith.constant 0 : index
        %c0_24 = arith.constant 0 : index
        %40 = vector.load %arg8[%c0_23, %c0_24] : memref<1x32xf32, #tpu.memory_space<vmem>>, vector<1x32xf32>
        %41 = tpu.reciprocal %40 {approx = true} : vector<1x32xf32> -> vector<1x32xf32>
        %c0_25 = arith.constant 0 : index
        %c0_26 = arith.constant 0 : index
        %42 = vector.load %arg8[%c0_25, %c0_26] : memref<1x32xf32, #tpu.memory_space<vmem>>, vector<1x32xf32>
        tpu.vector_store %arg8[%c0_25, %c0_26], %41 {strides = array<i32>} : memref<1x32xf32, #tpu.memory_space<vmem>>, vector<1x32xf32>,
      } else {
      }
      %c0_9 = arith.constant 0 : index
      %c0_10 = arith.constant 0 : index
      %22 = vector.load %arg8[%c0_9, %c0_10] : memref<1x32xf32, #tpu.memory_space<vmem>>, vector<1x32xf32>
      %23 = vector.broadcast %22 : vector<1x32xf32> to vector<16x32xf32>
      %24 = arith.mulf %12, %23 : vector<16x32xf32>
      %25 = arith.truncf %24 : vector<16x32xf32> to vector<16x32xbf16>
      %c0_11 = arith.constant 0 : index
      %c0_12 = arith.constant 0 : index
      %26 = vector.load %arg4[%c0_11, %c0_12] : memref<32x64xbf16, #tpu.memory_space<vmem>>, vector<32x64xbf16>
      %cst_13 = arith.constant dense<0.000000e+00> : vector<16x64xf32>
      %27 = tpu.matmul %25, %26, %cst_13 {dimension_numbers = #tpu.dot_dimension_numbers<[1], [0], [0], [1], [0, 0, 1, 1], [], []>} : vector<16x32xbf16>, vector<32x64xbf16>, vector<16x64xf32> -> vector<16x64xf32>
      %28 = arith.extf %0 : vector<16x64xbf16> to vector<16x64xf32>
      %29 = arith.addf %28, %27 : vector<16x64xf32>
      %30 = arith.truncf %29 : vector<16x64xf32> to vector<16x64xbf16>
      %c0_14 = arith.constant 0 : index
      %c0_15 = arith.constant 0 : index
      %31 = vector.load %arg5[%c0_14, %c0_15] : memref<64x128xbf16, #tpu.memory_space<vmem>>, vector<64x128xbf16>
      %cst_16 = arith.constant dense<0.000000e+00> : vector<16x128xf32>
      %32 = tpu.matmul %30, %31, %cst_16 {dimension_numbers = #tpu.dot_dimension_numbers<[1], [0], [0], [1], [0, 0, 1, 1], [], []>} : vector<16x64xbf16>, vector<64x128xbf16>, vector<16x128xf32> -> vector<16x128xf32>
      %cst_17 = arith.constant 2.000000e-01 : f32
      %33 = vector.broadcast %cst_17 : f32 to vector<16x128xf32>
      %34 = arith.mulf %33, %32 : vector<16x128xf32>
      %35 = arith.maximumf %32, %34 : vector<16x128xf32>
      %36 = arith.truncf %35 : vector<16x128xf32> to vector<16x128xbf16>
      %c0_18 = arith.constant 0 : index
      %c0_19 = arith.constant 0 : index
      %37 = vector.load %arg6[%c0_18, %c0_19] : memref<128x256xbf16, #tpu.memory_space<vmem>>, vector<128x256xbf16>
      %cst_20 = arith.constant dense<0.000000e+00> : vector<16x256xf32>
      %38 = tpu.matmul %36, %37, %cst_20 {dimension_numbers = #tpu.dot_dimension_numbers<[1], [0], [0], [1], [0, 0, 1, 1], [], []>} : vector<16x128xbf16>, vector<128x256xbf16>, vector<16x256xf32> -> vector<16x256xf32>
      %c0_21 = arith.constant 0 : index
      %c0_22 = arith.constant 0 : index
      %39 = vector.load %arg7[%c0_21, %c0_22] : memref<16x256xf32, #tpu.memory_space<vmem>>, vector<16x256xf32>
      tpu.vector_store %arg7[%c0_21, %c0_22], %38 {strides = array<i32>} : memref<16x256xf32, #tpu.memory_space<vmem>>, vector<16x256xf32>,
    } else {
    }
    return
  }
  func.func @transform_0(%arg0: i32, %arg1: i32) -> (i32, i32) {
    %c0_i32 = arith.constant 0 : i32
    %c0_i32_0 = arith.constant 0 : i32
    return %arg1, %c0_i32 : i32, i32
  }
  func.func @transform_1(%arg0: i32, %arg1: i32) -> (i32, i32) {
    %c0_i32 = arith.constant 0 : i32
    %c0_i32_0 = arith.constant 0 : i32
    %c0_i32_1 = arith.constant 0 : i32
    return %c0_i32, %c0_i32_0 : i32, i32
  }
  func.func @transform_2(%arg0: i32, %arg1: i32) -> (i32, i32) {
    %c0_i32 = arith.constant 0 : i32
    %c0_i32_0 = arith.constant 0 : i32
    %c0_i32_1 = arith.constant 0 : i32
    return %c0_i32, %c0_i32_0 : i32, i32
  }
  func.func @transform_3(%arg0: i32, %arg1: i32) -> (i32, i32) {
    %c0_i32 = arith.constant 0 : i32
    %c0_i32_0 = arith.constant 0 : i32
    %c0_i32_1 = arith.constant 0 : i32
    return %c0_i32, %c0_i32_0 : i32, i32
  }
  func.func @transform_4(%arg0: i32, %arg1: i32) -> (i32, i32) {
    %c0_i32 = arith.constant 0 : i32
    %c0_i32_0 = arith.constant 0 : i32
    %c0_i32_1 = arith.constant 0 : i32
    return %c0_i32, %c0_i32_0 : i32, i32
  }
  func.func @transform_5(%arg0: i32, %arg1: i32) -> (i32, i32) {
    %0 = arith.muli %arg1, %arg0 : i32
    %c0_i32 = arith.constant 0 : i32
    %c0_i32_0 = arith.constant 0 : i32
    return %0, %c0_i32 : i32, i32
  }
}

</mosaic_0001>

<bundles_post_ra>
// kernel: tpu_custom_call.1
= control target key start
LH: loop header
LB: loop body
LE: loop exit
PB: predicated region body
PF: predicated region fallthrough
CT: control target
= control target key end

     0   :  { %10 = vsyncpa [#allocation4], 0  ;;  %s1561_s0 = inlined_call_operand.vmem [shape: bf16[32,64], index: 0, kind: input, shape index: {}]   ;;  %s1562_s1 = inlined_call_operand.vmem [shape: bf16[64,32], index: 1, kind: input, shape index: {}]   ;;  %s1563_s2 = inlined_call_operand.hbm [shape: bf16[32,64], index: 2, kind: input, shape index: {}]   ;;  %s1564_s3 = inlined_call_operand.vmem [shape: bf16[64,128], index: 3, kind: input, shape index: {}]   ;;  %s1565_s4 = inlined_call_operand.hbm [shape: bf16[128,256], index: 4, kind: input, shape index: {}]   ;;  %s1566_s5 = inlined_call_operand.hbm [shape: f32[32,256], index: 5, kind: output, shape index: {}]  }
   0x1   :  { %11 = vsyncpa [#allocation7], 0 }
   0x2   :  { %12 = vsyncpa [#allocation5], 0 }
   0x3   :  { %14 = vsyncpa [#allocation5 + $0x1], 0  ;;  %s1299_s18 = smov 0   ;;  %s1301_s19 = smov 0  }
   0x4   :  { %s1303_s20 = smov 0   ;;  %s1305_s21 = smov 0  }
   0x5   :  { %s1307_s22 = smov 0   ;;  %s1309_s23 = smov 0  }
   0x6   :  { %s1311_s24 = smov 0   ;;  %s1313_s25 = smov 0  }
   0x7 LB: > { %1575 = sst [smem:[#allocation12_spill]] %s1243_s23  ;;  %s839_s26 = sadd.s32 4294967295, %s1251_s25   ;;  %s1251_s25 = sphi %s1313_s25, %s20_s25   ;;  %s1247_s24 = sphi %s1311_s24, %s1591_s24   ;;  %s1243_s23 = sphi %s1309_s23, %s1590_s23   ;;  %s1239_s22 = sphi %s1307_s22, %s1589_s22   ;;  %s1235_s21 = sphi %s1305_s21, %s1588_s21   ;;  %s1231_s20 = sphi %s1303_s20, %s1594_s20   ;;  %s1227_s19 = sphi %s1301_s19, %s1593_s19   ;;  %s1223_s18 = sphi %s1299_s18, %s1592_s18  }
   0x8   : > { %1576 = sst [smem:[#allocation13_spill]] %s1247_s24  ;;  %s840_s27 = sadd.s32 4294967294, %s1251_s25  }
   0x9   : > { %s29_s28 = sadd.s32 1, %s1243_s23  ;;  %s32_s29 = sadd.s32 1, %s1247_s24 }
   0xa   : > { %p30_p0 = scmp.ge.s32.totalorder %s29_s28, 2  ;;  %s146_s30 = smul.u32 %s1243_s23, %s1247_s24 }
   0xb   : > { %s151_s6 = sadd.s32 1, %s1231_s20  ;;  %p161_p1 = scmp.ne.s32.totalorder %s1231_s20, %s1227_s19 }
   0xc   : > { %s1596_s28 = smov (%p30_p0, %s29_s28), 0  ;;  %s1598_s29 = smov (!%p30_p0, %s32_s29), %s1247_s24 }
   0xd   : > { %1577 = sst [smem:[#allocation14_spill]] %s1596_s28  ;;  %p162_p2 = scmp.eq.s32.totalorder %s839_s26, 3 }
   0xe   : > { %p167_p3 = scmp.ne.s32.totalorder %s1227_s19, %s1223_s18  ;;  %p34_p4 = scmp.ge.s32.totalorder %s1598_s29, 2 }
   0xf   : > { %p168_p5 = scmp.eq.s32.totalorder %s840_s27, 3  ;;  %p1353_p6 = por %p162_p2, %p161_p1 }
  0x10   : > { %p841_p7 = scmp.ge.s32.totalorder %s1251_s25, 1  ;;  %s1600_s29 = smov (%p34_p4, %s1598_s29), 0 }
  0x11   : > { %s1578_s7 = scalar_select %p1353_p6, 1, 0 }
  0x12   : > { %1579 = sst [smem:[#allocation15_spill]] %s1600_s29  ;;  %p1360_p8 = por %p168_p5, %p167_p3 }
  0x13   : > { %p175_p9 = scmp.lt.s32.totalorder %s1251_s25, 5  ;;  %s147_s9 = smul.u32 %s1600_s29, %s1596_s28 }
  0x14   : > { %s1580_s8 = scalar_select %p1360_p8, 1, 0 }
  0x15   : > { %p1367_p10 = pnand %p841_p7, %p175_p9  ;;  %p1371_p11 = scmp.eq.s32.totalorder %s839_s26, 0 }
  0x16   : > { %s148_s12 = ssub.s32 %s146_s30, %s147_s9  ;;  %s1253_s13 = smov [#allocation3]  }
  0x17   : > { %s1581_s10 = scalar_select %p1367_p10, 1, 0 }
  0x18   : > { %s1582_s11 = scalar_select %p1371_p11, 1, 0 }
  0x19   : > { %p149_p12 = scmp.eq.s32.totalorder %s148_s12, 0  ;;  %p952_p13 = pneg %p1367_p10 }
  0x1a   : > { %s190_s14 = sshll.u32 %s1253_s13, 4  ;;  %s1254_s17 = smov [#allocation6]   ;;  %s191_s14 = int_to_ptr.vmem [resolvable:$true] %s190_s14 }
  0x1b   : > { %s1378_s15 = scalar_select %p149_p12, %s1231_s20, %s151_s6  }
  0x1c   : > { %p1382_p0 = pnand %p1371_p11, %p952_p13  ;;  %s206_s26 = sshll.u32 %s1254_s17, 4  ;;  %s207_s26 = int_to_ptr.vmem [resolvable:$true] %s206_s26 }
  0x1d   : > { %s1093_s30 = scalar_lea.hbm %s1563_s2, 256 }
  0x1e   : > { %p1094_p1 = scmp.ne.s32.totalorder %s1563_s2, %s1093_s30  ;;  %p1095_p2 = pneg %p1382_p0 }
  0x1f   : > { %p1100_p5 = scmp.lt.u32.totalorder %s1093_s30, %s1563_s2 }
  0x20   : > { %p1096_p3 = pnand %p1095_p2, %p1094_p1 }
  0x22   : > { %p1097_p4 = pneg %p1096_p3 }
  0x24   : > { %p1102_p7 = pnand %p1100_p5, %p1097_p4 }
  0x26   : > { %1105 = shalt.err (!%p1102_p7)
}
  0x27   : > { %s1106_s17 = scalar_lea.vmem %s191_s14, 256  ;;  %p1114_p8 = scmp.lt.s32.totalorder %s191_s14, %s191_s14 }
  0x28   : > { %p1107_p9 = scmp.ne.s32.totalorder %s191_s14, %s1106_s17  ;;  %p1115_p6 = scmp.lt.s32.totalorder %s1106_s17, %s1106_s17 }
  0x2a   : > { %p1109_p12 = pnand %p1107_p9, %p1095_p2  ;;  %p1116_p11 = por %p1115_p6, %p1114_p8 }
  0x2c   : > { %p1110_p13 = pneg %p1109_p12 }
  0x2e   : > { %p1117_p10 = pnand %p1116_p11, %p1110_p13 }
  0x30   : > { %1120 = shalt.err (!%p1117_p10)
}
  0x31   : > { %s1255_s29 = smov 64   ;;  %s1256_s27 = smov 4  }
  0x32   : > { %955 = dma.hbm_to_vmem [thread:$0]  (!%p1382_p0), %s1563_s2, 256, %s191_s14, [#allocation4], %s1255_s29, %s1255_s29, %s1256_s27  }
  0x33   : > { %s1121_s13 = scalar_lea.hbm %s1565_s4, 2048 }
  0x34   : > { %p1122_p6 = scmp.ne.s32.totalorder %s1565_s4, %s1121_s13  ;;  %p1128_p11 = scmp.lt.u32.totalorder %s1121_s13, %s1565_s4 }
  0x36   : > { %p1124_p8 = pnand %p1122_p6, %p1095_p2 }
  0x38   : > { %p1125_p10 = pneg %p1124_p8 }
  0x3a   : > { %p1130_p1 = pnand %p1128_p11, %p1125_p10 }
  0x3c   : > { %1133 = shalt.err (!%p1130_p1)
}
  0x3d   : > { %s1134_s14 = scalar_lea.vmem %s207_s26, 2048  ;;  %p1142_p7 = scmp.lt.s32.totalorder %s207_s26, %s207_s26 }
  0x3e   : > { %p1135_p3 = scmp.ne.s32.totalorder %s207_s26, %s1134_s14  ;;  %p1143_p9 = scmp.lt.s32.totalorder %s1134_s14, %s1134_s14 }
  0x40   : > { %p1137_p4 = pnand %p1135_p3, %p1095_p2  ;;  %p1144_p12 = por %p1143_p9, %p1142_p7 }
  0x42   : > { %p1138_p5 = pneg %p1137_p4 }
  0x44   : > { %p1145_p13 = pnand %p1144_p12, %p1138_p5 }
  0x46   : > { %1148 = shalt.err (!%p1145_p13)
}
  0x47   : > { %s1257_s24 = smov 128   ;;  %s1258_s28 = smov 8  }
  0x48   : > { %958 = dma.hbm_to_vmem [thread:$0]  (!%p1382_p0), %s1565_s4, 2048, %s207_s26, [#allocation7], %s1257_s24, %s1257_s24, %s1258_s28  }
  0x49   : > { %p1584_p6 = scmp.ne.s32.totalorder %s1581_s10, 0 }
  0x4a   : > { %p1585_p8 = scmp.ne.s32.totalorder (!%p1584_p6), %s1582_s11, 0 }
  0x4b   : > { %231 = sbr.rel (%p1584_p6) target bundleno = 1382 (0x566), region = 40 }
  0x52   : > { %1210 = dma.done.wait (%p1585_p8), [#allocation4], 256  }
  0x53   : > { %1212 = vsyncadd (%p1585_p8), [#allocation4], 4294967040 }
  0x54   : > { %1214 = dma.done.wait (%p1585_p8), [#allocation7], 2048  }
  0x55   : > { %1216 = vsyncadd (%p1585_p8), [#allocation7], 4294965248  ;;  %s260_s16 = sand.u32 1, %s1227_s19   ;;  %s849_s26 = sshll.u32 %s1235_s21, 1  ;;  %v1259_v0 = vmov 0.0   ;;  %vm1260_vm0 = vmmov 0  }
  0x56   : > { %s1442_s10 = sshll.u32 %s260_s16, 5  ;;  %910 = vmatprep.subr.bf16.mxu0 %v1259_v0  ;;  %918 = vmatprep.mubr.msk.bf16.mxu0 %vm1260_vm0, %v1259_v0  ;;  %p264_p0 = scmp.lt.s32.totalorder %s849_s26, 3  ;;  %v1047_v1 = vld [vmem:[%s1562_s1] sm:$0xff]   ;;  %v1048_v2 = vld [vmem:[%s1562_s1 + $0x8] sm:$0xff]   ;;  %v1049_v3 = vld [vmem:[%s1562_s1 + $0x10] sm:$0xff]   ;;  %vm311_vm1 = vcmask 523264  }
  0x57   : > { %911 = vmatpush3.bf16.msra.mxu0 %v1047_v1  ;;  %v1050_v4 = vld [vmem:[%s1562_s1 + $0x18] sm:$0xff]   ;;  %vm356_vm2 = vcmask 261120   ;;  %s1468_s29 = scalar_lea.vmem [#allocation8], %s1442_s10  ;;  %p857_p2 = scmp.ne.s32.totalorder %s1239_s22, 0 }
  0x58   : > { %s1602_s26 = smov (!%p264_p0, %s849_s26), 3  ;;  %912 = vmatprep.subr.bf16.mxu0 %v1259_v0  ;;  %p858_p10 = scmp.ne.s32.totalorder (!%p857_p2), %s1235_s21, 0 }
  0x59   : > { %s850_s12 = sshll.u32 %s1602_s26, 2 }
  0x5a   : > { %s267_s24 = scalar_lea.vmem %s1561_s0, %s850_s12 }
  0x5b   : > { %913 = vmatpush3.bf16.msra.mxu0 %v1048_v2  ;;  %v1459_v5 = vld [vmem:[%s267_s24] sm:$0xff]  }
  0x5c   : > { %914 = vmatprep.subr.bf16.mxu0 %v1259_v0 }
  0x5f   : > { %915 = vmatpush3.bf16.msra.mxu0 %v1049_v3 }
  0x60   : > { %916 = vmatprep.subr.bf16.mxu0 %v1259_v0 }
  0x63   : > { %917 = vmatpush3.bf16.msra.mxu0 %v1050_v4 }
  0x66   : > { %919 = vmatmul.mubr.msk.bf16.vlgmr.msra.gmra.mrb[0].mxu0 %vm311_vm1, %v1459_v5 }
 0x139   : > { %v349_v6 = vpop.f32.mrb[0].mxu0 }
 0x13a   : > { %v920_v7 = vpop.f32.mrb[1].mxu0  ;;  %v357_v8 = vsel %vm356_vm2, %v349_v6, -inf }
 0x13b   : > { %358 = vmax.xlane.f32.xlu0 %v357_v8  ;;  %v352_v9 = vpop.f32.mrb[2].mxu0 }
 0x13c   : > { %v921_v10 = vpop.f32.mrb[3].mxu0  ;;  %v360_v11 = vsel %vm356_vm2, %v352_v9, -inf }
 0x13f   : > { %361 = vmax.xlane.f32.xlu0 %v360_v11 }
 0x1c8   : > { %v359_v12 = vpop.xlane.xlu0 %358 }
 0x1c9   : > { %v363_v13 = vsub.f32 %v349_v6, %v359_v12 }
 0x1cb   : > { %v365_v14 = vmul.f32 1.442695, %v363_v13 }
 0x1cc   : > { %v362_v15 = vpop.xlane.xlu0 %361 }
 0x1cd   : > { %1053 = vpow2.f32 %v365_v14  ;;  %v364_v16 = vsub.f32 %v352_v9, %v362_v15 }
 0x1cf   : > { %v367_v17 = vmul.f32 1.442695, %v364_v16 }
 0x1d1   : > { %1055 = vpow2.f32 %v367_v17 }
 0x1d7   : > { %v1054_v18 = vpop.eup %1053 }
 0x1d8   : > { %v369_v19 = vsel %vm356_vm2, %v1054_v18, 0.0 }
 0x1d9   : > { %370 = vadd.xlane.f32.xlu1 %v369_v19 }
 0x1db   : > { %v1056_v20 = vpop.eup %1055 }
 0x1dc   : > { %v372_v21 = vsel %vm356_vm2, %v1056_v20, 0.0 }
 0x1dd   : > { %373 = vadd.xlane.f32.xlu1 %v372_v21 }
 0x266   : > { %v371_v22 = vpop.xlane.xlu1 %370 }
 0x267   : > { %1057 = vrcp.f32 %v371_v22 }
 0x26a   : > { %v374_v23 = vpop.xlane.xlu1 %373 }
 0x26b   : > { %1059 = vrcp.f32 %v374_v23 }
 0x270   : > { %382 = sbr.rel (%p857_p2) target bundleno = 668 (0x29c), region = 52 }
 0x271   : > { %v1058_v24 = vpop.eup %1057 }
 0x272   : > { %v377_v25 = vmul.f32 %v1058_v24, %v1054_v18 }
 0x275   : > { %v1060_v26 = vpop.eup %1059 }
 0x276   : > { %v378_v27 = vmul.f32 %v1060_v26, %v1056_v20 }
 0x277   : > { %386 = sbr.rel (%p858_p10) target bundleno = 638 (0x27e), region = 56  ;;  %vm387_vm3 = vcmask (!%p858_p10), 253952   ;;  %v1261_v28 = vmov (!%p858_p10), 0.0  }
 0x278   : > { %388 = vst.msk [vmem:[#allocation2] sm:$0x1] (!%p858_p10), %vm387_vm3, %v1261_v28 }
 0x27e PF: > { %s859_s26 = sshll.u32 %s1235_s21, 4  ;;  %v390_v29 = vlaneseq  ;;  %v1262_v35 = vmov 0.0   ;;  %vm415_vm6 = vcmask 253952  }
 0x27f   : > { %v393_v30 = vstv %s859_s26  ;;  %v404_v48 = vld [vmem:[#allocation2] sm:$0x1] }
 0x280   : > { %v391_v31 = vshrl.u32 %v390_v29, 7 }
 0x282   : > { %v392_v32 = vadd.s32 8, %v391_v31  ;;  %v394_v33 = vadd.s32 %v393_v30, %v391_v31 }
 0x284   : > { %v395_v34 = vadd.s32 %v393_v30, %v392_v32  ;;  %vm396_vm4 = vcmp.lt.s32.totalorder %v394_v33, 24 }
 0x285   : > { %v860_v36 = vsel %vm396_vm4, 1.0, %v1262_v35 }
 0x286   : > { %vm397_vm5 = vcmp.lt.s32.totalorder %v395_v34, 24  ;;  %v402_v37 = vmul.f32 %v860_v36, %v377_v25 }
 0x287   : > { %v861_v38 = vsel %vm397_vm5, 1.0, %v1262_v35 }
 0x288   : > { %v403_v39 = vmul.f32 %v861_v38, %v378_v27  ;;  %v405_v40 = vsel %vm356_vm2, %v402_v37, 0.0 }
 0x28a   : > { %v406_v41 = vsel %vm356_vm2, %v403_v39, 0.0 }
 0x28b   : > { %v407_v42 = vadd.f32 %v406_v41, %v405_v40 }
 0x28d   : > { %v408_v43 = vrot.slane %v407_v42, 4 }
 0x28f   : > { %v409_v44 = vadd.f32 %v408_v43, %v407_v42 }
 0x291   : > { %v410_v45 = vrot.slane %v409_v44, 2 }
 0x293   : > { %v411_v46 = vadd.f32 %v410_v45, %v409_v44 }
 0x295   : > { %v412_v47 = vrot.slane %v411_v46, 1 }
 0x297   : > { %v413_v49 = vadd.f32 %v412_v47, %v411_v46 }
 0x299   : > { %v414_v50 = vadd.f32 %v413_v49, %v404_v48 }
 0x29b   : > { %416 = vst.msk [vmem:[#allocation2] sm:$0x1] %vm415_vm6, %v414_v50 }
 0x29c PF: > { %p862_p11 = scmp.ne.s32.totalorder %s1239_s22, 1 }
 0x29d   : > { %p863_p1 = scmp.ne.s32.totalorder (!%p862_p11), %s1235_s21, 0 }
 0x29e   : > { %420 = sbr.rel (%p862_p11) target bundleno = 1355 (0x54b), region = 60 }
 0x2a5   : > { %424 = sbr.rel (%p863_p1) target bundleno = 690 (0x2b2), region = 64  ;;  %v425_v51 = vld [vmem:[#allocation2] sm:$0x1] (!%p863_p1)  ;;  %vm427_vm7 = vcmask (!%p863_p1), 253952  }
 0x2a6   : > { %1061 = vrcp.f32 (!%p863_p1), %v425_v51 }
 0x2b0   : > { %v1062_v52 = vpop.eup %1061 }
 0x2b1   : > { %428 = vst.msk [vmem:[#allocation2] sm:$0x1] %vm427_vm7, %v1062_v52 }
 0x2b2 PF: > { %v1063_v53 = vld [vmem:[#allocation3] sm:$0xff]   ;;  %v1263_v54 = vmov 0.0   ;;  %v1064_v55 = vld [vmem:[#allocation3 + $0x8] sm:$0xff]   ;;  %vm1264_vm8 = vmmov 0   ;;  %v1068_v63 = vld [vmem:[%s1564_s3 + $0x18] sm:$0xff]   ;;  %v499_v13 = vunpack.c.l.bf16 %v1459_v5  ;;  %v500_v14 = vunpack.c.h.bf16 %v1459_v5 }
 0x2b3   : > { %922 = vmatprep.subr.bf16.mxu1 %v1263_v54  ;;  %926 = vmatprep.mubr.msk.bf16.mxu1 %vm1264_vm8, %v1263_v54  ;;  %v1065_v59 = vld [vmem:[%s1564_s3] sm:$0xff]   ;;  %v1066_v61 = vld [vmem:[%s1564_s3 + $0x8] sm:$0xff]   ;;  %v1067_v62 = vld [vmem:[%s1564_s3 + $0x10] sm:$0xff]   ;;  %v1265_v5 = vmov 0  }
 0x2b4   : > { %923 = vmatpush3.bf16.msra.mxu1 %v1063_v53  ;;  %v1069_v0 = vld [vmem:[#allocation6 + $0x4] ss:$8 sps:$4 sm:$0xff]   ;;  %v1071_v1 = vld [vmem:[#allocation6] ss:$8 sps:$4 sm:$0xff]   ;;  %v1072_v2 = vld [vmem:[#allocation6 + $0x14] ss:$8 sps:$4 sm:$0xff]   ;;  %713 = vmatprep.mubr.bf16.mxu0 %v1265_v5 }
 0x2b5   : > { %924 = vmatprep.subr.bf16.mxu1 %v1263_v54  ;;  %681 = vmatprep.subr.bf16.mxu0 %v1069_v0  ;;  %v1074_v3 = vld [vmem:[#allocation6 + $0x10] ss:$8 sps:$4 sm:$0xff]   ;;  %v1075_v4 = vld [vmem:[#allocation6 + $0x24] ss:$8 sps:$4 sm:$0xff]   ;;  %v1077_v6 = vld [vmem:[#allocation6 + $0x20] ss:$8 sps:$4 sm:$0xff]  }
 0x2b6   : > { %682 = vmatpush1.bf16.msra.mxu0 %v1071_v1  ;;  %v1078_v7 = vld [vmem:[#allocation6 + $0x34] ss:$8 sps:$4 sm:$0xff]   ;;  %v1080_v8 = vld [vmem:[#allocation6 + $0x30] ss:$8 sps:$4 sm:$0xff]   ;;  %v1081_v9 = vld [vmem:[#allocation6 + $0x44] ss:$8 sps:$4 sm:$0xff]  }
 0x2b7   : > { %683 = vmatprep.subr.bf16.mxu0 %v1072_v2  ;;  %v1083_v10 = vld [vmem:[#allocation6 + $0x40] ss:$8 sps:$4 sm:$0xff]   ;;  %v1084_v11 = vld [vmem:[#allocation6 + $0x54] ss:$8 sps:$4 sm:$0xff]   ;;  %v1086_v12 = vld [vmem:[#allocation6 + $0x50] ss:$8 sps:$4 sm:$0xff]  }
 0x2b8   : > { %v864_v56 = vld [vmem:[#allocation2] ss:$0 sm:$0xff]  ;;  %925 = vmatpush3.bf16.msra.mxu1 %v1064_v55  ;;  %v1089_v23 = vld [vmem:[#allocation6 + $0x60] ss:$8 sps:$4 sm:$0xff]   ;;  %v1090_v24 = vld [vmem:[#allocation6 + $0x74] ss:$8 sps:$4 sm:$0xff]  }
 0x2b9   : > { %v436_v57 = vmul.f32 %v864_v56, %v377_v25  ;;  %v437_v58 = vmul.f32 %v864_v56, %v378_v27  ;;  %930 = vmatprep.subr.bf16.mxu1 %v1263_v54  ;;  %v1087_v22 = vld [vmem:[#allocation6 + $0x64] ss:$8 sps:$4 sm:$0xff]   ;;  %v1092_v25 = vld [vmem:[#allocation6 + $0x70] ss:$8 sps:$4 sm:$0xff]  }
 0x2ba   : > { %684 = vmatpush1.bf16.msra.mxu0 %v1074_v3 }
 0x2bb   : > { %v438_v60 = vpack.c.bf16 %v437_v58, %v436_v57  ;;  %685 = vmatprep.subr.bf16.mxu0 %v1075_v4 }
 0x2bd   : > { %927 = vmatmul.mubr.msk.bf16.vlgmr.msra.gmra.mrb[0].mxu1 %vm356_vm2, %v438_v60 }
 0x2be   : > { %931 = vmatpush3.bf16.msra.mxu1 %v1065_v59  ;;  %938 = vmatprep.mubr.msk.bf16.mxu1 %vm1264_vm8, %v1263_v54 }
 0x2bf   : > { %932 = vmatprep.subr.bf16.mxu1 %v1263_v54  ;;  %686 = vmatpush1.bf16.msra.mxu0 %v1077_v6 }
 0x2c0   : > { %687 = vmatprep.subr.bf16.mxu0 %v1078_v7 }
 0x2c2   : > { %933 = vmatpush3.bf16.msra.mxu1 %v1066_v61 }
 0x2c3   : > { %934 = vmatprep.subr.bf16.mxu1 %v1263_v54  ;;  %688 = vmatpush1.bf16.msra.mxu0 %v1080_v8 }
 0x2c4   : > { %689 = vmatprep.subr.bf16.mxu0 %v1081_v9 }
 0x2c6   : > { %935 = vmatpush3.bf16.msra.mxu1 %v1067_v62 }
 0x2c7   : > { %936 = vmatprep.subr.bf16.mxu1 %v1263_v54  ;;  %690 = vmatpush1.bf16.msra.mxu0 %v1083_v10 }
 0x2c8   : > { %691 = vmatprep.subr.bf16.mxu0 %v1084_v11 }
 0x2ca   : > { %937 = vmatpush3.bf16.msra.mxu1 %v1068_v63 }
 0x2cb   : > { %692 = vmatpush1.bf16.msra.mxu0 %v1086_v12 }
 0x2cc   : > { %693 = vmatprep.subr.bf16.mxu0 %v1087_v22 }
 0x2cf   : > { %694 = vmatpush1.bf16.msra.mxu0 %v1089_v23 }
 0x2d0   : > { %695 = vmatprep.subr.bf16.mxu0 %v1090_v24 }
 0x2d3   : > { %696 = vmatpush1.bf16.msra.mxu0 %v1092_v25 }
 0x390   : > { %v492_v15 = vpop.f32.mrb[0].mxu1 }
 0x391   : > { %v928_v16 = vpop.f32.mrb[1].mxu1  ;;  %v501_v18 = vadd.f32 %v499_v13, %v492_v15 }
 0x392   : > { %v495_v17 = vpop.f32.mrb[2].mxu1 }
 0x393   : > { %v502_v19 = vadd.f32 %v500_v14, %v495_v17  ;;  %v929_v20 = vpop.f32.mrb[3].mxu1 }
 0x395   : > { %v503_v21 = vpack.c.bf16 %v502_v19, %v501_v18 }
 0x397   : > { %939 = vmatmul.mubr.msk.bf16.vlgmr.msra.gmra.mrb[4].mxu1 %vm311_vm1, %v503_v21 }
 0x46a   : > { %v573_v26 = vpop.f32.mrb[4].mxu1 }
 0x46b   : > { %v580_v27 = vmul.f32 0.2, %v573_v26  ;;  %v940_v28 = vpop.f32.mrb[5].mxu1 }
 0x46c   : > { %v576_v29 = vpop.f32.mrb[6].mxu1 }
 0x46d   : > { %v581_v30 = vmul.f32 0.2, %v576_v29  ;;  %v941_v31 = vpop.f32.mrb[7].mxu1  ;;  %v582_v32 = vmax.f32 %v573_v26, %v580_v27 }
 0x46f   : > { %v583_v33 = vmax.f32 %v576_v29, %v581_v30 }
 0x471   : > { %v584_v34 = vpack.c.bf16 %v583_v33, %v582_v32 }
 0x473   : > { %714 = vmatmul.mubr.bf16.vlgmr.msra.gmra.mrb[0].mxu0 %v584_v34 }
 0x546   : > { %v715_v35 = vpop.f32.mrb[0].mxu0 }
 0x547   : > { %724 = vst [vmem:[%s1468_s29] sm:$0xff] %v715_v35  ;;  %v717_v36 = vpop.f32.mrb[1].mxu0 }
 0x548   : > { %725 = vst [vmem:[%s1468_s29 + $0x8] sm:$0xff] %v717_v36  ;;  %v719_v37 = vpop.f32.mrb[2].mxu0 }
 0x549   : > { %726 = vst [vmem:[%s1468_s29 + $0x10] sm:$0xff] %v719_v37  ;;  %v721_v38 = vpop.f32.mrb[3].mxu0 }
 0x54a   : > { %727 = vst [vmem:[%s1468_s29 + $0x18] sm:$0xff] %v721_v38 }
 0x54b PF: > { %s736_s17 = smul.u32 %s1235_s21, %s1239_s22  ;;  %s744_s14 = sshll.u32 %s1468_s29, 4  ;;  %s1500_s14 = int_to_ptr.vmem [resolvable:$true] %s744_s14 }
 0x54c   : > { %s1509_s10 = scalar_lea.sflag [#allocation5], %s260_s16  ;;  %s1149_s27 = scalar_lea.vmem %s1500_s14, 512 }
 0x54d   : > { %s896_s24 = sshll.u32 %s736_s17, 9  ;;  %p1150_p3 = scmp.ne.s32.totalorder %s1500_s14, %s1149_s27 }
 0x54e   : > { %s1505_s26 = scalar_lea.hbm %s1566_s5, %s896_s24  ;;  %p1586_p4 = scmp.ne.s32.totalorder %s1578_s7, 0 }
 0x54f   : > { %s1266_s21 = smov [#allocation8]  }
 0x550   : > { %p1151_p5 = pnand %p1150_p3, %p1586_p4  ;;  %s1153_s22 = sshll.u32 %s1266_s21, 4  ;;  %s1154_s22 = int_to_ptr.vmem [resolvable:$false] %s1153_s22 }
 0x551   : > { %s1155_s29 = scalar_lea.vmem %s1154_s22, 1024  ;;  %p1156_p9 = scmp.lt.s32.totalorder %s1500_s14, %s1154_s22 }
 0x552   : > { %p1152_p7 = pneg %p1151_p5  ;;  %p1157_p12 = scmp.lt.s32.totalorder %s1155_s29, %s1149_s27 }
 0x554   : > { %p1158_p13 = por %p1157_p12, %p1156_p9 }
 0x556   : > { %p1159_p6 = pnand %p1158_p13, %p1152_p7 }
 0x558   : > { %1162 = shalt.err (!%p1159_p6)
}
 0x559   : > { %s1163_s16 = scalar_lea.hbm %s1505_s26, 512  ;;  %s1167_s9 = scalar_lea.hbm %s1566_s5, 1024 }
 0x55a   : > { %p1164_p8 = scmp.ne.s32.totalorder %s1505_s26, %s1163_s16  ;;  %p1168_p10 = scmp.lt.u32.totalorder %s1505_s26, %s1566_s5 }
 0x55b   : > { %p1169_p11 = scmp.lt.u32.totalorder %s1167_s9, %s1163_s16  ;;  %p1171_p3 = scmp.lt.u32.totalorder %s1163_s16, %s1505_s26 }
 0x55c   : > { %p1165_p0 = pnand %p1164_p8, %p1586_p4 }
 0x55d   : > { %p1170_p1 = por %p1169_p11, %p1168_p10 }
 0x55e   : > { %p1166_p2 = pneg %p1165_p0 }
 0x55f   : > { %p1172_p5 = por %p1171_p3, %p1170_p1 }
 0x561   : > { %p1173_p7 = pnand %p1172_p5, %p1166_p2 }
 0x563   : > { %1176 = shalt.err (!%p1173_p7)
}
 0x564   : > { %s1267_s13 = smov 256   ;;  %s1268_s17 = smov 16  }
 0x565   : > { %950 = dma.vmem_to_hbm [thread:$0]  (%p1586_p4), %s1500_s14, 512, %s1505_s26, %s1509_s10, %s1267_s13, %s1267_s13, %s1268_s17  }
 0x566 PF: > { %p967_p9 = scmp.ge.s32.totalorder %s1251_s25, 2  ;;  %s759_s24 = sand.u32 1, %s1223_s18  }
 0x567   : > { %p1587_p12 = scmp.ne.s32.totalorder %s1580_s8, 0  ;;  %s760_s28 = scalar_lea.sflag [#allocation5], %s759_s24 }
 0x569   : > { %p960_p13 = pnand %p967_p9, %p1587_p12 }
 0x56b   : > { %1218 = dma.done.wait (!%p960_p13), %s760_s28, 512  }
 0x56c   : > { %1220 = vsyncadd (!%p960_p13), %s760_s28, 4294966784  ;;  %s20_s25 = sadd.s32 1, %s1251_s25   ;;  %s1588_s21 = sld [smem:[#allocation12_spill]] }
 0x56d   : > { %p17_p6 = scmp.ge.s32.totalorder %s20_s25, 6   ;;  %s1589_s22 = sld [smem:[#allocation13_spill]] }
 0x56e   : > { %s1590_s23 = sld [smem:[#allocation14_spill]]  ;;  %s1591_s24 = sld [smem:[#allocation15_spill]] }
 0x56f   : > { %s1592_s18 = smov %s1227_s19  ;;  %s1593_s19 = smov %s1231_s20 }
 0x570   : > { %s1594_s20 = smov %s1378_s15  ;;  %19 = sbr.rel (!%p17_p6) target bundleno = 7 (0x7), region = 100 }
 0x577   :  { %765 = vsyncpa [#allocation4], 1 }
 0x578   :  { %767 = vsyncpa [#allocation4 + $0x1], 1 }
 0x579   :  { %768 = vsyncpa [#allocation7], 1 }
 0x57a   :  { %769 = vsyncpa [#allocation5], 1 }
 0x57b   :  { %771 = vsyncpa [#allocation5 + $0x1], 1 }

</bundles_post_ra>
